<compile_context>
chip_gen: v7x
topology: tpu7x:2x2x1
jax: 0.10.0
libtpu: 0.0.40
codegen_flags: <defaults>
</compile_context>

<pallas_src>
import functools

import jax
import jax.numpy as jnp
from jax.experimental import pallas as pl
from jax.experimental.pallas import tpu as pltpu

EPS = 1e-08


def _make_kernel(Mt, C_in, C_out, K, L_out, stride, dilation):
    inv_n = 1.0 / float(C_out * L_out)

    def kernel(x_ref, w_ref, alpha_ref, gamma_ref, beta_ref, o_ref):
        # x_ref: (Mt, C_in, L_pad) in input dtype
        # w_ref: (K, C_out, C_in) folded (pointwise * depthwise-tap) weights
        a = alpha_ref[0]                    # PReLU scalar (SMEM, f32)
        gamma = gamma_ref[...]              # [1, L_out] f32
        beta = beta_ref[...]                # [1, L_out] f32

        # Static unroll over the Mt samples in this block (Mt <= 4).
        for m in range(Mt):
            x_m = x_ref[m]                  # [C_in, L_pad], input dtype

            # Depthwise folded into pointwise: K accumulated MXU matmuls with
            # bf16/f32 operands straight from VMEM and an f32 accumulate.
            acc = None
            for k in range(K):
                start = k * dilation
                stop = start + (L_out - 1) * stride + 1
                if stride == 1:
                    xs = x_m[:, start:stop]            # [C_in, L_out]
                else:
                    xs = x_m[:, start:stop:stride]     # [C_in, L_out]
                term = jnp.dot(w_ref[k], xs,
                               preferred_element_type=jnp.float32)
                acc = term if acc is None else acc + term   # [C_out, L_out] f32

            # PReLU (single shared parameter), f32 on the VPU.
            act = jnp.where(acc > 0, acc, a * acc)

            # gLN: single-pass stats per sample, hoisted affine.
            s = jnp.sum(act)
            ss = jnp.sum(act * act)
            mean = s * inv_n
            var = jnp.maximum(ss * inv_n - mean * mean, 0.0)  # cancellation guard
            inv_std = jax.lax.rsqrt(var + EPS)                # EUP

            scale = gamma * inv_std                           # [1, L_out]
            shift = beta - mean * scale                       # [1, L_out]
            o_ref[m] = (act * scale + shift).astype(o_ref.dtype)

    return kernel


@functools.partial(jax.jit, static_argnames=("stride", "padding", "dilation"))
def depthwise_separable_conv(x, w_dw, w_pw, alpha, gamma, beta,
                             *, stride=1, padding=0, dilation=1):
    """x: [M, C_in, L]; w_dw: [C_in, 1, K]; w_pw: [C_out, C_in, 1];
    alpha: scalar PReLU weight; gamma/beta: [1, 1, C_out]."""
    M, C_in, L = x.shape
    K = w_dw.shape[-1]
    C_out = w_pw.shape[0]
    L_out = (L + 2 * padding - dilation * (K - 1) - 1) // stride + 1

    # The source module's gLN broadcasts [1,1,C_out] params against the conv
    # output's last (time) dim, so it requires L_out == out_channels.
    assert gamma.shape[-1] == L_out and beta.shape[-1] == L_out, (
        "GlobalLayerNorm in the source module requires L_out == out_channels "
        f"(got L_out={L_out}, channel_size={gamma.shape[-1]})")

    # Only the conv padding -- no extra lane-alignment pad (block last dims
    # equal the full array dims, exempt from the (8,128) rule).
    L_pad = L + 2 * padding
    x_p = jnp.pad(x, ((0, 0), (0, 0), (padding, padding)))

    # Samples per grid step: batch everything when M is tiny (accepting one
    # un-pipelined step), otherwise 4 per step so larger batches keep several
    # grid steps per TensorCore for DMA/compute overlap.
    Mt = M if M <= 4 else 4
    M_pad = ((M + Mt - 1) // Mt) * Mt
    if M_pad != M:
        x_p = jnp.pad(x_p, ((0, M_pad - M), (0, 0), (0, 0)))

    # Fold the depthwise taps into the pointwise weights:
    #   W[k, o, c] = w_pw[o, c] * w_dw[c, k]     -> [K, C_out, C_in]
    w_dw2 = w_dw.reshape(C_in, K).astype(jnp.float32)
    w_pw2 = w_pw.reshape(C_out, C_in).astype(jnp.float32)
    w_folded = (w_pw2[None, :, :] * jnp.transpose(w_dw2)[:, None, :]).astype(x.dtype)

    gamma2 = gamma.reshape(1, L_out).astype(jnp.float32)
    beta2 = beta.reshape(1, L_out).astype(jnp.float32)
    alpha1 = jnp.asarray(alpha, jnp.float32).reshape(1)

    kernel = _make_kernel(Mt, C_in, C_out, K, L_out, stride, dilation)

    # Chip-aware VMEM budget: double-buffered in/out blocks + params + live
    # f32 temporaries (acc/act/normalized per sample), clamped to 3/4 of the
    # physical VMEM reported for this generation (64 MiB v7x, 128 MiB v5e/v6e).
    isz = jnp.dtype(x.dtype).itemsize
    blk_in = Mt * C_in * L_pad * isz
    blk_out = Mt * C_out * L_out * isz
    params_b = K * C_out * C_in * isz + 2 * L_out * 4 + 4
    temps_b = Mt * 3 * C_out * L_out * 4
    needed = 2 * (blk_in + blk_out) + params_b + temps_b + (1 << 20)
    try:
        cap = getattr(pltpu.get_tpu_info(), "vmem_capacity_bytes", 64 << 20)
    except Exception:
        cap = 64 << 20
    vmem_limit = int(min(max(needed, 16 << 20), (cap * 3) // 4))

    out = pl.pallas_call(
        kernel,
        out_shape=jax.ShapeDtypeStruct((M_pad, C_out, L_out), x.dtype),
        grid_spec=pltpu.PrefetchScalarGridSpec(
            num_scalar_prefetch=0,
            grid=(M_pad // Mt,),
            in_specs=[
                pl.BlockSpec((Mt, C_in, L_pad), lambda i: (i, 0, 0)),
                pl.BlockSpec((K, C_out, C_in), lambda i: (0, 0, 0)),
                pl.BlockSpec(memory_space=pltpu.MemorySpace.SMEM),
                pl.BlockSpec((1, L_out), lambda i: (0, 0)),
                pl.BlockSpec((1, L_out), lambda i: (0, 0)),
            ],
            out_specs=pl.BlockSpec((Mt, C_out, L_out), lambda i: (i, 0, 0)),
        ),
        compiler_params=pltpu.CompilerParams(
            dimension_semantics=("parallel",),
            vmem_limit_bytes=vmem_limit,
        ),
    )(x_p, w_folded, alpha1, gamma2, beta2)

    return out[:M] if M_pad != M else out


def reference_forward(x, w_dw, w_pw, alpha, gamma, beta,
                      *, stride, padding, dilation):
    """Pure-JAX mirror of the PyTorch forward."""
    C_in = x.shape[1]
    dw = jax.lax.conv_general_dilated(
        x, w_dw, window_strides=(stride,), padding=[(padding, padding)],
        rhs_dilation=(dilation,), feature_group_count=C_in,
        dimension_numbers=("NCH", "OIH", "NCH"))
    pw = jax.lax.conv_general_dilated(
        dw, w_pw, window_strides=(1,), padding=[(0, 0)],
        dimension_numbers=("NCH", "OIH", "NCH"))
    act = jnp.where(pw > 0, pw, alpha * pw)
    mean = jnp.mean(jnp.mean(act, axis=1, keepdims=True), axis=2, keepdims=True)
    var = jnp.mean(jnp.mean((act - mean) ** 2, axis=1, keepdims=True),
                   axis=2, keepdims=True)
    return gamma * (act - mean) / jnp.power(var + EPS, 0.5) + beta


if __name__ == "__main__":
    key = jax.random.PRNGKey(0)
    k_x, k_dw, k_pw = jax.random.split(key, 3)

    # Small, deterministic demo shapes. L / padding / dilation chosen so that
    # L_out = 128 = out_channels (required by the source module's gLN
    # broadcast) and the output last dim is lane-dense (128).
    M, C_in, C_out = 2, 16, 128
    L, kernel_size, stride, padding, dilation = 128, 3, 1, 2, 2

    x = jax.random.normal(k_x, (M, C_in, L), dtype=jnp.float32)
    w_dw = 0.3 * jax.random.normal(k_dw, (C_in, 1, kernel_size), dtype=jnp.float32)
    w_pw = (1.0 / jnp.sqrt(C_in)) * jax.random.normal(
        k_pw, (C_out, C_in, 1), dtype=jnp.float32)
    alpha = jnp.float32(0.25)                            # PReLU default init
    gamma = jnp.ones((1, 1, C_out), dtype=jnp.float32)   # reset_parameters()
    beta = jnp.zeros((1, 1, C_out), dtype=jnp.float32)

    out = depthwise_separable_conv(
        x, w_dw, w_pw, alpha, gamma, beta,
        stride=stride, padding=padding, dilation=dilation)
    out = jax.block_until_ready(out)

    ref = reference_forward(
        x, w_dw, w_pw, alpha, gamma, beta,
        stride=stride, padding=padding, dilation=dilation)

    assert out.shape == ref.shape == (M, C_out, 128)
    assert jnp.allclose(out, ref, atol=1e-3, rtol=1e-3), (
        "mismatch vs reference: max abs diff = "
        f"{float(jnp.max(jnp.abs(out - ref)))}")

    print("KERNEL_OK")
</pallas_src>

<mosaic_0001>
module attributes {stable_mosaic.version = 11 : i64} {
  func.func @kernel(%arg0: i32, %arg1: memref<2x16x132xf32, #tpu.memory_space<vmem>>, %arg2: memref<3x128x16xf32, #tpu.memory_space<vmem>>, %arg3: memref<1xf32, #tpu.memory_space<smem>>, %arg4: memref<1x128xf32, #tpu.memory_space<vmem>>, %arg5: memref<1x128xf32, #tpu.memory_space<vmem>>, %arg6: memref<2x128x128xf32, #tpu.memory_space<vmem>>) attributes {dimension_semantics = [#tpu.dimension_semantics<parallel>], iteration_bounds = array<i64: 1>, scalar_prefetch = 0 : i64, scratch_operands = 0 : i64, tpu.core_type = #tpu.core_type<tc>, window_params = [{transform_indices = @transform_0, window_bounds = array<i64: 2, 16, 132>}, {pipeline_mode = #tpu.pipeline_mode<synchronous>, transform_indices = @transform_1, window_bounds = array<i64: 3, 128, 16>}, {transform_indices = @transform_2, window_bounds = array<i64: 1>}, {pipeline_mode = #tpu.pipeline_mode<synchronous>, transform_indices = @transform_3, window_bounds = array<i64: 1, 128>}, {pipeline_mode = #tpu.pipeline_mode<synchronous>, transform_indices = @transform_4, window_bounds = array<i64: 1, 128>}, {transform_indices = @transform_5, window_bounds = array<i64: 2, 128, 128>}]} {
    %c0 = arith.constant 0 : index
    %0 = memref.load %arg3[%c0] : memref<1xf32, #tpu.memory_space<smem>>
    %c0_0 = arith.constant 0 : index
    %c0_1 = arith.constant 0 : index
    %1 = vector.load %arg4[%c0_0, %c0_1] : memref<1x128xf32, #tpu.memory_space<vmem>>, vector<1x128xf32>
    %c0_2 = arith.constant 0 : index
    %c0_3 = arith.constant 0 : index
    %2 = vector.load %arg5[%c0_2, %c0_3] : memref<1x128xf32, #tpu.memory_space<vmem>>, vector<1x128xf32>
    %c0_4 = arith.constant 0 : index
    %c0_5 = arith.constant 0 : index
    %c0_6 = arith.constant 0 : index
    %3 = vector.load %arg1[%c0_4, %c0_5, %c0_6] : memref<2x16x132xf32, #tpu.memory_space<vmem>>, vector<1x16x132xf32>
    %4 = vector.shape_cast %3 : vector<1x16x132xf32> to vector<16x132xf32>
    %5 = vector.extract_strided_slice %4 {offsets = [0, 0], sizes = [16, 128], strides = [1, 1]} : vector<16x132xf32> to vector<16x128xf32>
    %c0_7 = arith.constant 0 : index
    %c0_8 = arith.constant 0 : index
    %c0_9 = arith.constant 0 : index
    %6 = vector.load %arg2[%c0_7, %c0_8, %c0_9] : memref<3x128x16xf32, #tpu.memory_space<vmem>>, vector<1x128x16xf32>
    %7 = vector.shape_cast %6 : vector<1x128x16xf32> to vector<128x16xf32>
    %cst = arith.constant dense<0.000000e+00> : vector<128x128xf32>
    %8 = tpu.matmul %7, %5, %cst {dimension_numbers = #tpu.dot_dimension_numbers<[1], [0], [0], [1], [0, 0, 1, 1], [], []>} : vector<128x16xf32>, vector<16x128xf32>, vector<128x128xf32> -> vector<128x128xf32>
    %9 = vector.extract_strided_slice %4 {offsets = [0, 2], sizes = [16, 128], strides = [1, 1]} : vector<16x132xf32> to vector<16x128xf32>
    %c1 = arith.constant 1 : index
    %c0_10 = arith.constant 0 : index
    %c0_11 = arith.constant 0 : index
    %10 = vector.load %arg2[%c1, %c0_10, %c0_11] : memref<3x128x16xf32, #tpu.memory_space<vmem>>, vector<1x128x16xf32>
    %11 = vector.shape_cast %10 : vector<1x128x16xf32> to vector<128x16xf32>
    %cst_12 = arith.constant dense<0.000000e+00> : vector<128x128xf32>
    %12 = tpu.matmul %11, %9, %cst_12 {dimension_numbers = #tpu.dot_dimension_numbers<[1], [0], [0], [1], [0, 0, 1, 1], [], []>} : vector<128x16xf32>, vector<16x128xf32>, vector<128x128xf32> -> vector<128x128xf32>
    %13 = arith.addf %8, %12 : vector<128x128xf32>
    %14 = vector.extract_strided_slice %4 {offsets = [0, 4], sizes = [16, 128], strides = [1, 1]} : vector<16x132xf32> to vector<16x128xf32>
    %c2 = arith.constant 2 : index
    %c0_13 = arith.constant 0 : index
    %c0_14 = arith.constant 0 : index
    %15 = vector.load %arg2[%c2, %c0_13, %c0_14] : memref<3x128x16xf32, #tpu.memory_space<vmem>>, vector<1x128x16xf32>
    %16 = vector.shape_cast %15 : vector<1x128x16xf32> to vector<128x16xf32>
    %cst_15 = arith.constant dense<0.000000e+00> : vector<128x128xf32>
    %17 = tpu.matmul %16, %14, %cst_15 {dimension_numbers = #tpu.dot_dimension_numbers<[1], [0], [0], [1], [0, 0, 1, 1], [], []>} : vector<128x16xf32>, vector<16x128xf32>, vector<128x128xf32> -> vector<128x128xf32>
    %18 = arith.addf %13, %17 : vector<128x128xf32>
    %cst_16 = arith.constant 0.000000e+00 : f32
    %19 = vector.broadcast %cst_16 : f32 to vector<128x128xf32>
    %20 = arith.cmpf ogt, %18, %19 : vector<128x128xf32>
    %21 = vector.broadcast %0 : f32 to vector<128x128xf32>
    %22 = arith.mulf %21, %18 : vector<128x128xf32>
    %23 = arith.select %20, %18, %22 : vector<128x128xi1>, vector<128x128xf32>
    %24 = vector.shape_cast %23 : vector<128x128xf32> to vector<1x128x128xf32>
    %cst_17 = arith.constant dense<0.000000e+00> : vector<1xf32>
    %25 = vector.multi_reduction <add>, %24, %cst_17 [1, 2] : vector<1x128x128xf32> to vector<1xf32>
    %26 = vector.shape_cast %25 : vector<1xf32> to vector<1x1x1xf32>
    %27 = vector.extract %26[0, 0, 0] : f32 from vector<1x1x1xf32>
    %28 = arith.mulf %23, %23 : vector<128x128xf32>
    %29 = vector.shape_cast %28 : vector<128x128xf32> to vector<1x128x128xf32>
    %cst_18 = arith.constant dense<0.000000e+00> : vector<1xf32>
    %30 = vector.multi_reduction <add>, %29, %cst_18 [1, 2] : vector<1x128x128xf32> to vector<1xf32>
    %31 = vector.shape_cast %30 : vector<1xf32> to vector<1x1x1xf32>
    %32 = vector.extract %31[0, 0, 0] : f32 from vector<1x1x1xf32>
    %cst_19 = arith.constant 6.10351563E-5 : f32
    %33 = arith.mulf %27, %cst_19 : f32
    %cst_20 = arith.constant 6.10351563E-5 : f32
    %34 = arith.mulf %32, %cst_20 : f32
    %35 = arith.mulf %33, %33 : f32
    %36 = arith.subf %34, %35 : f32
    %cst_21 = arith.constant 0.000000e+00 : f32
    %37 = arith.maximumf %36, %cst_21 : f32
    %cst_22 = arith.constant 9.99999993E-9 : f32
    %38 = arith.addf %37, %cst_22 : f32
    %39 = math.rsqrt %38 : f32
    %40 = vector.broadcast %39 : f32 to vector<1x128xf32>
    %41 = arith.mulf %1, %40 : vector<1x128xf32>
    %42 = vector.broadcast %33 : f32 to vector<1x128xf32>
    %43 = arith.mulf %42, %41 : vector<1x128xf32>
    %44 = arith.subf %2, %43 : vector<1x128xf32>
    %45 = vector.broadcast %41 : vector<1x128xf32> to vector<128x128xf32>
    %46 = arith.mulf %23, %45 : vector<128x128xf32>
    %47 = vector.broadcast %44 : vector<1x128xf32> to vector<128x128xf32>
    %48 = arith.addf %46, %47 : vector<128x128xf32>
    %c0_23 = arith.constant 0 : index
    %c0_24 = arith.constant 0 : index
    %c0_25 = arith.constant 0 : index
    %49 = vector.load %arg6[%c0_23, %c0_24, %c0_25] : memref<2x128x128xf32, #tpu.memory_space<vmem>>, vector<1x128x128xf32>
    %50 = vector.shape_cast %49 : vector<1x128x128xf32> to vector<128x128xf32>
    %51 = vector.shape_cast %48 : vector<128x128xf32> to vector<1x128x128xf32>
    tpu.vector_store %arg6[%c0_23, %c0_24, %c0_25], %51 {strides = array<i32>} : memref<2x128x128xf32, #tpu.memory_space<vmem>>, vector<1x128x128xf32>,
    %c1_26 = arith.constant 1 : index
    %c0_27 = arith.constant 0 : index
    %c0_28 = arith.constant 0 : index
    %52 = vector.load %arg1[%c1_26, %c0_27, %c0_28] : memref<2x16x132xf32, #tpu.memory_space<vmem>>, vector<1x16x132xf32>
    %53 = vector.shape_cast %52 : vector<1x16x132xf32> to vector<16x132xf32>
    %54 = vector.extract_strided_slice %53 {offsets = [0, 0], sizes = [16, 128], strides = [1, 1]} : vector<16x132xf32> to vector<16x128xf32>
    %c0_29 = arith.constant 0 : index
    %c0_30 = arith.constant 0 : index
    %c0_31 = arith.constant 0 : index
    %55 = vector.load %arg2[%c0_29, %c0_30, %c0_31] : memref<3x128x16xf32, #tpu.memory_space<vmem>>, vector<1x128x16xf32>
    %56 = vector.shape_cast %55 : vector<1x128x16xf32> to vector<128x16xf32>
    %cst_32 = arith.constant dense<0.000000e+00> : vector<128x128xf32>
    %57 = tpu.matmul %56, %54, %cst_32 {dimension_numbers = #tpu.dot_dimension_numbers<[1], [0], [0], [1], [0, 0, 1, 1], [], []>} : vector<128x16xf32>, vector<16x128xf32>, vector<128x128xf32> -> vector<128x128xf32>
    %58 = vector.extract_strided_slice %53 {offsets = [0, 2], sizes = [16, 128], strides = [1, 1]} : vector<16x132xf32> to vector<16x128xf32>
    %c1_33 = arith.constant 1 : index
    %c0_34 = arith.constant 0 : index
    %c0_35 = arith.constant 0 : index
    %59 = vector.load %arg2[%c1_33, %c0_34, %c0_35] : memref<3x128x16xf32, #tpu.memory_space<vmem>>, vector<1x128x16xf32>
    %60 = vector.shape_cast %59 : vector<1x128x16xf32> to vector<128x16xf32>
    %cst_36 = arith.constant dense<0.000000e+00> : vector<128x128xf32>
    %61 = tpu.matmul %60, %58, %cst_36 {dimension_numbers = #tpu.dot_dimension_numbers<[1], [0], [0], [1], [0, 0, 1, 1], [], []>} : vector<128x16xf32>, vector<16x128xf32>, vector<128x128xf32> -> vector<128x128xf32>
    %62 = arith.addf %57, %61 : vector<128x128xf32>
    %63 = vector.extract_strided_slice %53 {offsets = [0, 4], sizes = [16, 128], strides = [1, 1]} : vector<16x132xf32> to vector<16x128xf32>
    %c2_37 = arith.constant 2 : index
    %c0_38 = arith.constant 0 : index
    %c0_39 = arith.constant 0 : index
    %64 = vector.load %arg2[%c2_37, %c0_38, %c0_39] : memref<3x128x16xf32, #tpu.memory_space<vmem>>, vector<1x128x16xf32>
    %65 = vector.shape_cast %64 : vector<1x128x16xf32> to vector<128x16xf32>
    %cst_40 = arith.constant dense<0.000000e+00> : vector<128x128xf32>
    %66 = tpu.matmul %65, %63, %cst_40 {dimension_numbers = #tpu.dot_dimension_numbers<[1], [0], [0], [1], [0, 0, 1, 1], [], []>} : vector<128x16xf32>, vector<16x128xf32>, vector<128x128xf32> -> vector<128x128xf32>
    %67 = arith.addf %62, %66 : vector<128x128xf32>
    %cst_41 = arith.constant 0.000000e+00 : f32
    %68 = vector.broadcast %cst_41 : f32 to vector<128x128xf32>
    %69 = arith.cmpf ogt, %67, %68 : vector<128x128xf32>
    %70 = vector.broadcast %0 : f32 to vector<128x128xf32>
    %71 = arith.mulf %70, %67 : vector<128x128xf32>
    %72 = arith.select %69, %67, %71 : vector<128x128xi1>, vector<128x128xf32>
    %73 = vector.shape_cast %72 : vector<128x128xf32> to vector<1x128x128xf32>
    %cst_42 = arith.constant dense<0.000000e+00> : vector<1xf32>
    %74 = vector.multi_reduction <add>, %73, %cst_42 [1, 2] : vector<1x128x128xf32> to vector<1xf32>
    %75 = vector.shape_cast %74 : vector<1xf32> to vector<1x1x1xf32>
    %76 = vector.extract %75[0, 0, 0] : f32 from vector<1x1x1xf32>
    %77 = arith.mulf %72, %72 : vector<128x128xf32>
    %78 = vector.shape_cast %77 : vector<128x128xf32> to vector<1x128x128xf32>
    %cst_43 = arith.constant dense<0.000000e+00> : vector<1xf32>
    %79 = vector.multi_reduction <add>, %78, %cst_43 [1, 2] : vector<1x128x128xf32> to vector<1xf32>
    %80 = vector.shape_cast %79 : vector<1xf32> to vector<1x1x1xf32>
    %81 = vector.extract %80[0, 0, 0] : f32 from vector<1x1x1xf32>
    %cst_44 = arith.constant 6.10351563E-5 : f32
    %82 = arith.mulf %76, %cst_44 : f32
    %cst_45 = arith.constant 6.10351563E-5 : f32
    %83 = arith.mulf %81, %cst_45 : f32
    %84 = arith.mulf %82, %82 : f32
    %85 = arith.subf %83, %84 : f32
    %cst_46 = arith.constant 0.000000e+00 : f32
    %86 = arith.maximumf %85, %cst_46 : f32
    %cst_47 = arith.constant 9.99999993E-9 : f32
    %87 = arith.addf %86, %cst_47 : f32
    %88 = math.rsqrt %87 : f32
    %89 = vector.broadcast %88 : f32 to vector<1x128xf32>
    %90 = arith.mulf %1, %89 : vector<1x128xf32>
    %91 = vector.broadcast %82 : f32 to vector<1x128xf32>
    %92 = arith.mulf %91, %90 : vector<1x128xf32>
    %93 = arith.subf %2, %92 : vector<1x128xf32>
    %94 = vector.broadcast %90 : vector<1x128xf32> to vector<128x128xf32>
    %95 = arith.mulf %72, %94 : vector<128x128xf32>
    %96 = vector.broadcast %93 : vector<1x128xf32> to vector<128x128xf32>
    %97 = arith.addf %95, %96 : vector<128x128xf32>
    %c1_48 = arith.constant 1 : index
    %c0_49 = arith.constant 0 : index
    %c0_50 = arith.constant 0 : index
    %98 = vector.load %arg6[%c1_48, %c0_49, %c0_50] : memref<2x128x128xf32, #tpu.memory_space<vmem>>, vector<1x128x128xf32>
    %99 = vector.shape_cast %98 : vector<1x128x128xf32> to vector<128x128xf32>
    %100 = vector.shape_cast %97 : vector<128x128xf32> to vector<1x128x128xf32>
    tpu.vector_store %arg6[%c1_48, %c0_49, %c0_50], %100 {strides = array<i32>} : memref<2x128x128xf32, #tpu.memory_space<vmem>>, vector<1x128x128xf32>,
    return
  }
  func.func @transform_0(%arg0: i32) -> (i32, i32, i32) {
    %c0_i32 = arith.constant 0 : i32
    %c0_i32_0 = arith.constant 0 : i32
    %c0_i32_1 = arith.constant 0 : i32
    return %arg0, %c0_i32, %c0_i32_0 : i32, i32, i32
  }
  func.func @transform_1(%arg0: i32) -> (i32, i32, i32) {
    %c0_i32 = arith.constant 0 : i32
    %c0_i32_0 = arith.constant 0 : i32
    %c0_i32_1 = arith.constant 0 : i32
    %c0_i32_2 = arith.constant 0 : i32
    return %c0_i32, %c0_i32_0, %c0_i32_1 : i32, i32, i32
  }
  func.func @transform_2(%arg0: i32) -> i32 {
    %c0_i32 = arith.constant 0 : i32
    %c0_i32_0 = arith.constant 0 : i32
    return %c0_i32 : i32
  }
  func.func @transform_3(%arg0: i32) -> (i32, i32) {
    %c0_i32 = arith.constant 0 : i32
    %c0_i32_0 = arith.constant 0 : i32
    %c0_i32_1 = arith.constant 0 : i32
    return %c0_i32, %c0_i32_0 : i32, i32
  }
  func.func @transform_4(%arg0: i32) -> (i32, i32) {
    %c0_i32 = arith.constant 0 : i32
    %c0_i32_0 = arith.constant 0 : i32
    %c0_i32_1 = arith.constant 0 : i32
    return %c0_i32, %c0_i32_0 : i32, i32
  }
  func.func @transform_5(%arg0: i32) -> (i32, i32, i32) {
    %c0_i32 = arith.constant 0 : i32
    %c0_i32_0 = arith.constant 0 : i32
    %c0_i32_1 = arith.constant 0 : i32
    return %arg0, %c0_i32, %c0_i32_0 : i32, i32, i32
  }
}

</mosaic_0001>

<bundles_post_ra>
// kernel: depthwise_separable_conv.1
= control target key start
LH: loop header
LB: loop body
LE: loop exit
PB: predicated region body
PF: predicated region fallthrough
CT: control target
= control target key end

     0   :  { %vm79_vm0 = vcmask 130048   ;;  %s2385_s28 = smov 124   ;;  %s2386_s29 = smov 126   ;;  %s3001_s0 = inlined_call_operand.vmem [shape: f32[2,16,132], index: 0, kind: input, shape index: {}]   ;;  %s3002_s1 = inlined_call_operand.vmem [shape: f32[3,128,16], index: 1, kind: input, shape index: {}]   ;;  %s3003_s2 = inlined_call_operand.<no memory space> [shape: f32[1], index: 2, kind: input, shape index: {}]   ;;  %s3004_s3 = inlined_call_operand.vmem [shape: f32[1,128], index: 3, kind: input, shape index: {}]   ;;  %s3005_s4 = inlined_call_operand.vmem [shape: f32[1,128], index: 4, kind: input, shape index: {}]   ;;  %s3006_s5 = inlined_call_operand.hbm [shape: f32[2,128,128], index: 5, kind: output, shape index: {}]  }
   0x1   :  { %v25_v0 = vld [vmem:[%s3001_s0] sm:$0xff]  ;;  %v26_v1 = vld [vmem:[%s3001_s0 + $0x8] sm:$0xff]  ;;  %v27_v2 = vld [vmem:[%s3001_s0 + $0x10] sm:$0xff] }
   0x2   :  { %v2327_v3 = vpack.i.bf16 %v26_v1, %v25_v0  ;;  %v28_v4 = vld [vmem:[%s3001_s0 + $0x18] sm:$0xff]  ;;  %v1771_v5 = vld [vmem:[%s3002_s1 + $0x80] sm:$0xff]  ;;  %v1853_v7 = vld [vmem:[%s3001_s0 + $0x30] sm:$0xff]  ;;  %v2215_v8 = vpack.c.bf16 %v27_v2, %v25_v0 }
   0x3   :  { %v2332_v6 = vpack.i.bf16 %v28_v4, %v27_v2 }
   0x4   :  { %2328 = vrot.lane.b32.xlu1 %v2327_v3, %s2385_s28  ;;  %2318 = vrot.lane.b32.xlu0 %v2327_v3, %s2386_s29 }
   0x5   :  { %11 = vsyncpa [#allocation4], 0  ;;  %v1854_v9 = vld [vmem:[%s3001_s0 + $0x38] sm:$0xff]  ;;  %v1851_v10 = vld [vmem:[%s3001_s0 + $0x20] sm:$0xff]  ;;  %2047 = vmatprep.mubr.msk.f32.mxu0 %vm79_vm0, %v1771_v5  ;;  %2131 = vmatprep.mubr.msk.f32.mxu1 %vm79_vm0, %v1771_v5  ;;  %vm74_vm1 = vcmask 1031168   ;;  %vm491_vm2 = vcmask 1014784  }
   0x6   :  { %v1852_v11 = vld [vmem:[%s3001_s0 + $0x28] sm:$0xff]  ;;  %v2342_v12 = vpack.i.bf16 %v1854_v9, %v1853_v7  ;;  %v2227_v14 = vpack.c.bf16 %v1853_v7, %v1851_v10  ;;  %v1773_v45 = vld [vmem:[%s3002_s1 + $0x90] sm:$0xff]  ;;  %v1774_v50 = vld [vmem:[%s3002_s1 + $0x98] sm:$0xff]  ;;  %s2387_s9 = smov 0.0   ;;  %s2388_s23 = smov [#allocation3]  }
   0x7   :  { %v2337_v13 = vpack.i.bf16 %v1852_v11, %v1851_v10  ;;  %v1772_v38 = vld [vmem:[%s3002_s1 + $0x88] sm:$0xff]  ;;  %v1775_v53 = vld [vmem:[%s3002_s1 + $0xa0] sm:$0xff]  ;;  %v1777_v56 = vld [vmem:[%s3002_s1 + $0xb0] sm:$0xff]  ;;  %s1760_s24 = sshll.u32 %s2388_s23, 4  ;;  %s2982_s24 = int_to_ptr.vmem [resolvable:$true] %s1760_s24 }
   0x8   :  { %2333 = vrot.lane.b32.xlu1 %v2332_v6, %s2385_s28  ;;  %2323 = vrot.lane.b32.xlu0 %v2332_v6, %s2386_s29  ;;  %v1776_v55 = vld [vmem:[%s3002_s1 + $0xa8] sm:$0xff]  ;;  %v1778_v57 = vld [vmem:[%s3002_s1 + $0xb8] sm:$0xff]  ;;  %s2361_s25 = scalar_lea.vmem %s2982_s24, 4096  ;;  %p2366_p1 = scmp.lt.s32.totalorder %s2982_s24, %s2982_s24 }
   0x9   :  { %v1779_v58 = vld [vmem:[%s3002_s1 + $0xc0] sm:$0xff]  ;;  %v1780_v59 = vld [vmem:[%s3002_s1 + $0xc8] sm:$0xff]  ;;  %v1781_v60 = vld [vmem:[%s3002_s1 + $0xd0] sm:$0xff]  ;;  %p2362_p0 = scmp.ne.s32.totalorder %s2982_s24, %s2361_s25  ;;  %p2367_p2 = scmp.lt.s32.totalorder %s2361_s25, %s2361_s25 }
   0xa   :  { %v1782_v61 = vld [vmem:[%s3002_s1 + $0xd8] sm:$0xff]  ;;  %v1783_v62 = vld [vmem:[%s3002_s1 + $0xe0] sm:$0xff]  ;;  %v1784_v63 = vld [vmem:[%s3002_s1 + $0xe8] sm:$0xff] }
   0xb   :  { %v1785_v0 = vld [vmem:[%s3002_s1 + $0xf0] sm:$0xff]  ;;  %v1786_v1 = vld [vmem:[%s3002_s1 + $0xf8] sm:$0xff]  ;;  %v29_v2 = vld [vmem:[%s3002_s1] sm:$0xff]  ;;  %p2368_p3 = por %p2367_p2, %p2366_p1 }
   0xc   :  { %2343 = vrot.lane.b32.xlu1 %v2342_v12, %s2386_s29  ;;  %2338 = vrot.lane.b32.xlu0 %v2337_v13, %s2386_s29  ;;  %v30_v3 = vld [vmem:[%s3002_s1 + $0x8] sm:$0xff]  ;;  %v31_v4 = vld [vmem:[%s3002_s1 + $0x10] sm:$0xff] }
   0xd   :  { %v32_v5 = vld [vmem:[%s3002_s1 + $0x18] sm:$0xff]  ;;  %v33_v6 = vld [vmem:[%s3002_s1 + $0x20] sm:$0xff]  ;;  %v34_v7 = vld [vmem:[%s3002_s1 + $0x28] sm:$0xff]  ;;  %p2369_p4 = pnand %p2368_p3, %p2362_p0 }
   0xe   :  { %v36_v9 = vld [vmem:[%s3002_s1 + $0x38] sm:$0xff]  ;;  %v37_v10 = vld [vmem:[%s3002_s1 + $0x40] sm:$0xff]  ;;  %v38_v11 = vld [vmem:[%s3002_s1 + $0x48] sm:$0xff] }
  0x10   :  { %2353 = vrot.lane.b32.xlu1 %v2342_v12, %s2385_s28  ;;  %2348 = vrot.lane.b32.xlu0 %v2337_v13, %s2385_s28  ;;  %v39_v12 = vld [vmem:[%s3002_s1 + $0x50] sm:$0xff]  ;;  %v40_v13 = vld [vmem:[%s3002_s1 + $0x58] sm:$0xff] }
  0x76   :  { %v2329_v15 = vpop.permute.xlu1 %2328  ;;  %v2319_v16 = vpop.permute.xlu0 %2318 }
  0x77   :  { %v2321_v17 = vunpack.i.h.bf16 %v2319_v16  ;;  %v2320_v18 = vunpack.i.l.bf16 %v2319_v16  ;;  %v2331_v19 = vunpack.i.h.bf16 %v2329_v15  ;;  %v2330_v20 = vunpack.i.l.bf16 %v2329_v15  ;;  %v42_v15 = vld [vmem:[%s3002_s1 + $0x68] sm:$0xff]  ;;  %v43_v16 = vld [vmem:[%s3002_s1 + $0x70] sm:$0xff] }
  0x79   :  { %v75_v27 = vsel %vm74_vm1, %v2320_v18, %v2321_v17  ;;  %v492_v32 = vsel %vm491_vm2, %v2330_v20, %v2331_v19  ;;  %v44_v17 = vld [vmem:[%s3002_s1 + $0x78] sm:$0xff]  ;;  %v1819_v18 = vld [vmem:[%s3002_s1 + $0x100] sm:$0xff]  ;;  %v1820_v19 = vld [vmem:[%s3002_s1 + $0x108] sm:$0xff] }
  0x7a   :  { %v2334_v21 = vpop.permute.xlu1 %2333  ;;  %v2324_v22 = vpop.permute.xlu0 %2323  ;;  %v1821_v20 = vld [vmem:[%s3002_s1 + $0x110] sm:$0xff] }
  0x7b   :  { %v2336_v23 = vunpack.i.h.bf16 %v2334_v21  ;;  %v2335_v24 = vunpack.i.l.bf16 %v2334_v21  ;;  %v2326_v25 = vunpack.i.h.bf16 %v2324_v22  ;;  %v2325_v26 = vunpack.i.l.bf16 %v2324_v22  ;;  %v1822_v21 = vld [vmem:[%s3002_s1 + $0x118] sm:$0xff]  ;;  %v1823_v22 = vld [vmem:[%s3002_s1 + $0x120] sm:$0xff] }
  0x7d   :  { %v76_v28 = vsel %vm74_vm1, %v2325_v26, %v2326_v25  ;;  %v493_v33 = vsel %vm491_vm2, %v2335_v24, %v2336_v23  ;;  %v1824_v23 = vld [vmem:[%s3002_s1 + $0x128] sm:$0xff]  ;;  %v1825_v24 = vld [vmem:[%s3002_s1 + $0x130] sm:$0xff]  ;;  %v1826_v25 = vld [vmem:[%s3002_s1 + $0x138] sm:$0xff] }
  0x7e   :  { %v2344_v29 = vpop.permute.xlu1 %2343  ;;  %v2339_v30 = vpop.permute.xlu0 %2338  ;;  %v2211_v31 = vpack.c.bf16 %v76_v28, %v75_v27  ;;  %v2459_v42 = vpack.c.bf16 %v493_v33, %v492_v32  ;;  %v1827_v26 = vld [vmem:[%s3002_s1 + $0x140] sm:$0xff]  ;;  %v1828_v27 = vld [vmem:[%s3002_s1 + $0x148] sm:$0xff]  ;;  %v1829_v28 = vld [vmem:[%s3002_s1 + $0x150] sm:$0xff] }
  0x7f   :  { %v2346_v34 = vunpack.i.h.bf16 %v2344_v29  ;;  %v2345_v35 = vunpack.i.l.bf16 %v2344_v29  ;;  %v2341_v36 = vunpack.i.h.bf16 %v2339_v30  ;;  %v2340_v37 = vunpack.i.l.bf16 %v2339_v30  ;;  %v1830_v29 = vld [vmem:[%s3002_s1 + $0x158] sm:$0xff]  ;;  %v1831_v30 = vld [vmem:[%s3002_s1 + $0x160] sm:$0xff]  ;;  %v1833_v32 = vld [vmem:[%s3002_s1 + $0x170] sm:$0xff] }
  0x80   :  { %2212 = vmatprep.subr.bf16.mxu0 %v2211_v31  ;;  %v1834_v33 = vld [vmem:[%s3002_s1 + $0x178] sm:$0xff] }
  0x81   :  { %2214 = vmatpush3.bf16.msra.mxu0 %v2211_v31  ;;  %v941_v39 = vsel %vm74_vm1, %v2340_v37, %v2341_v36  ;;  %v942_v40 = vsel %vm74_vm1, %v2345_v35, %v2346_v34  ;;  %v1832_v31 = vld [vmem:[%s3002_s1 + $0x168] sm:$0xff]  ;;  %v2700_v34 = vstv %s3003_s2 }
  0x82   :  { %2216 = vmatprep.subr.bf16.mxu0 %v2215_v8  ;;  %v2223_v41 = vpack.c.bf16 %v942_v40, %v941_v39  ;;  %v2354_v43 = vpop.permute.xlu1 %2353  ;;  %v2349_v44 = vpop.permute.xlu0 %2348 }
  0x83   :  { %v2356_v46 = vunpack.i.h.bf16 %v2354_v43  ;;  %v2355_v47 = vunpack.i.l.bf16 %v2354_v43  ;;  %v2351_v48 = vunpack.i.h.bf16 %v2349_v44  ;;  %v2350_v49 = vunpack.i.l.bf16 %v2349_v44 }
  0x84   :  { %2048 = vmatmul.mubr.msk.f32.vlgmr.msra.gmra.mrb[0].mxu0 %vm79_vm0, %v1772_v38  ;;  %2224 = vmatprep.subr.bf16.mxu1 %v2223_v41 }
  0x85   :  { %2218 = vmatpush3.bf16.msra.mxu0 %v2215_v8  ;;  %2226 = vmatpush3.bf16.msra.mxu1 %v2223_v41  ;;  %v1355_v51 = vsel %vm491_vm2, %v2350_v49, %v2351_v48  ;;  %v1356_v52 = vsel %vm491_vm2, %v2355_v47, %v2356_v46  ;;  %v35_v8 = vld [vmem:[%s3002_s1 + $0x30] sm:$0xff] }
  0x86   :  { %2050 = vmatprep.mubr.msk.f32.mxu0 %vm79_vm0, %v1773_v45  ;;  %2220 = vmatprep.subr.bf16.mxu0 %v2459_v42  ;;  %v2231_v54 = vpack.c.bf16 %v1356_v52, %v1355_v51 }
  0x87   :  { %2228 = vmatprep.subr.bf16.mxu1 %v2227_v14 }
  0x88   :  { %2051 = vmatmul.mubr.msk.f32.gmra.mrb[2].mxu0 %vm79_vm0, %v1774_v50  ;;  %2132 = vmatmul.mubr.msk.f32.vlgmr.msra.gmra.mrb[0].mxu1 %vm79_vm0, %v1772_v38 }
  0x89   :  { %2053 = vmatprep.mubr.msk.f32.mxu0 %vm79_vm0, %v1775_v53  ;;  %2134 = vmatprep.mubr.msk.f32.mxu1 %vm79_vm0, %v1773_v45 }
  0x8a   :  { %2230 = vmatpush3.bf16.msra.mxu1 %v2227_v14  ;;  %v41_v14 = vld [vmem:[%s3002_s1 + $0x60] sm:$0xff] }
  0x8b   :  { %2232 = vmatprep.subr.bf16.mxu1 %v2231_v54 }
  0x8c   :  { %2054 = vmatmul.mubr.msk.f32.gmra.mrb[4].mxu0 %vm79_vm0, %v1776_v55  ;;  %2135 = vmatmul.mubr.msk.f32.gmra.mrb[2].mxu1 %vm79_vm0, %v1774_v50 }
  0x8d   :  { %2056 = vmatprep.mubr.msk.f32.mxu0 %vm79_vm0, %v1777_v56  ;;  %2137 = vmatprep.mubr.msk.f32.mxu1 %vm79_vm0, %v1775_v53 }
  0x90   :  { %2057 = vmatmul.mubr.msk.f32.gmra.mrb[6].mxu0 %vm79_vm0, %v1778_v57  ;;  %2138 = vmatmul.mubr.msk.f32.gmra.mrb[4].mxu1 %vm79_vm0, %v1776_v55 }
  0x91   :  { %2059 = vmatprep.mubr.msk.f32.mxu0 %vm79_vm0, %v1779_v58  ;;  %2140 = vmatprep.mubr.msk.f32.mxu1 %vm79_vm0, %v1777_v56 }
  0x94   :  { %2060 = vmatmul.mubr.msk.f32.gmra.mrb[8].mxu0 %vm79_vm0, %v1780_v59  ;;  %2141 = vmatmul.mubr.msk.f32.gmra.mrb[6].mxu1 %vm79_vm0, %v1778_v57 }
  0x95   :  { %2062 = vmatprep.mubr.msk.f32.mxu0 %vm79_vm0, %v1781_v60  ;;  %2143 = vmatprep.mubr.msk.f32.mxu1 %vm79_vm0, %v1779_v58 }
  0x98   :  { %2063 = vmatmul.mubr.msk.f32.gmra.mrb[10].mxu0 %vm79_vm0, %v1782_v61  ;;  %2144 = vmatmul.mubr.msk.f32.gmra.mrb[8].mxu1 %vm79_vm0, %v1780_v59 }
  0x99   :  { %2065 = vmatprep.mubr.msk.f32.mxu0 %vm79_vm0, %v1783_v62  ;;  %2146 = vmatprep.mubr.msk.f32.mxu1 %vm79_vm0, %v1781_v60 }
  0x9c   :  { %2066 = vmatmul.mubr.msk.f32.gmra.mrb[12].mxu0 %vm79_vm0, %v1784_v63  ;;  %2147 = vmatmul.mubr.msk.f32.gmra.mrb[10].mxu1 %vm79_vm0, %v1782_v61 }
  0x9d   :  { %2068 = vmatprep.mubr.msk.f32.mxu0 %vm79_vm0, %v1785_v0  ;;  %2149 = vmatprep.mubr.msk.f32.mxu1 %vm79_vm0, %v1783_v62 }
  0xa0   :  { %2069 = vmatmul.mubr.msk.f32.gmra.mrb[14].mxu0 %vm79_vm0, %v1786_v1  ;;  %2150 = vmatmul.mubr.msk.f32.gmra.mrb[12].mxu1 %vm79_vm0, %v1784_v63 }
  0xa1   :  { %2075 = vmatprep.mubr.msk.f32.mxu0 %vm79_vm0, %v29_v2  ;;  %2152 = vmatprep.mubr.msk.f32.mxu1 %vm79_vm0, %v1785_v0 }
  0xa4   :  { %2076 = vmatmul.mubr.msk.f32.vlgmr.msra.gmra.mrb[0].mxu0 %vm79_vm0, %v30_v3  ;;  %2153 = vmatmul.mubr.msk.f32.gmra.mrb[14].mxu1 %vm79_vm0, %v1786_v1 }
  0xa5   :  { %2222 = vmatpush3.bf16.msra.mxu0 %v2459_v42  ;;  %2078 = vmatprep.mubr.msk.f32.mxu0 %vm79_vm0, %v31_v4 }
  0xa6   :  { %2159 = vmatprep.mubr.msk.f32.mxu1 %vm79_vm0, %v29_v2 }
  0xa8   :  { %2079 = vmatmul.mubr.msk.f32.gmra.mrb[2].mxu0 %vm79_vm0, %v32_v5  ;;  %2160 = vmatmul.mubr.msk.f32.vlgmr.msra.gmra.mrb[0].mxu1 %vm79_vm0, %v30_v3 }
  0xa9   :  { %2081 = vmatprep.mubr.msk.f32.mxu0 %vm79_vm0, %v33_v6  ;;  %2162 = vmatprep.mubr.msk.f32.mxu1 %vm79_vm0, %v31_v4 }
  0xaa   :  { %2234 = vmatpush3.bf16.msra.mxu1 %v2231_v54 }
  0xac   :  { %2082 = vmatmul.mubr.msk.f32.gmra.mrb[4].mxu0 %vm79_vm0, %v34_v7  ;;  %2163 = vmatmul.mubr.msk.f32.gmra.mrb[2].mxu1 %vm79_vm0, %v32_v5 }
  0xad   :  { %2084 = vmatprep.mubr.msk.f32.mxu0 %vm79_vm0, %v35_v8  ;;  %2165 = vmatprep.mubr.msk.f32.mxu1 %vm79_vm0, %v33_v6 }
  0xb0   :  { %2085 = vmatmul.mubr.msk.f32.gmra.mrb[6].mxu0 %vm79_vm0, %v36_v9  ;;  %2166 = vmatmul.mubr.msk.f32.gmra.mrb[4].mxu1 %vm79_vm0, %v34_v7 }
  0xb1   :  { %2087 = vmatprep.mubr.msk.f32.mxu0 %vm79_vm0, %v37_v10  ;;  %2168 = vmatprep.mubr.msk.f32.mxu1 %vm79_vm0, %v35_v8 }
  0xb4   :  { %2088 = vmatmul.mubr.msk.f32.gmra.mrb[8].mxu0 %vm79_vm0, %v38_v11  ;;  %2169 = vmatmul.mubr.msk.f32.gmra.mrb[6].mxu1 %vm79_vm0, %v36_v9 }
  0xb5   :  { %2090 = vmatprep.mubr.msk.f32.mxu0 %vm79_vm0, %v39_v12  ;;  %2171 = vmatprep.mubr.msk.f32.mxu1 %vm79_vm0, %v37_v10 }
  0xb8   :  { %2091 = vmatmul.mubr.msk.f32.gmra.mrb[10].mxu0 %vm79_vm0, %v40_v13  ;;  %2172 = vmatmul.mubr.msk.f32.gmra.mrb[8].mxu1 %vm79_vm0, %v38_v11 }
  0xb9   :  { %2093 = vmatprep.mubr.msk.f32.mxu0 %vm79_vm0, %v41_v14  ;;  %2174 = vmatprep.mubr.msk.f32.mxu1 %vm79_vm0, %v39_v12 }
  0xbc   :  { %2094 = vmatmul.mubr.msk.f32.gmra.mrb[12].mxu0 %vm79_vm0, %v42_v15  ;;  %2175 = vmatmul.mubr.msk.f32.gmra.mrb[10].mxu1 %vm79_vm0, %v40_v13 }
  0xbd   :  { %2096 = vmatprep.mubr.msk.f32.mxu0 %vm79_vm0, %v43_v16  ;;  %2177 = vmatprep.mubr.msk.f32.mxu1 %vm79_vm0, %v41_v14 }
  0xc0   :  { %2097 = vmatmul.mubr.msk.f32.gmra.mrb[14].mxu0 %vm79_vm0, %v44_v17  ;;  %2178 = vmatmul.mubr.msk.f32.gmra.mrb[12].mxu1 %vm79_vm0, %v42_v15 }
  0xc1   :  { %2103 = vmatprep.mubr.msk.f32.mxu0 %vm79_vm0, %v1819_v18  ;;  %2180 = vmatprep.mubr.msk.f32.mxu1 %vm79_vm0, %v43_v16 }
  0xc4   :  { %2104 = vmatmul.mubr.msk.f32.vlgmr.msra.gmra.mrb[0].mxu0 %vm79_vm0, %v1820_v19  ;;  %2181 = vmatmul.mubr.msk.f32.gmra.mrb[14].mxu1 %vm79_vm0, %v44_v17 }
  0xc5   :  { %2106 = vmatprep.mubr.msk.f32.mxu0 %vm79_vm0, %v1821_v20  ;;  %2187 = vmatprep.mubr.msk.f32.mxu1 %vm79_vm0, %v1819_v18 }
  0xc8   :  { %2107 = vmatmul.mubr.msk.f32.gmra.mrb[2].mxu0 %vm79_vm0, %v1822_v21  ;;  %2188 = vmatmul.mubr.msk.f32.vlgmr.msra.gmra.mrb[0].mxu1 %vm79_vm0, %v1820_v19 }
  0xc9   :  { %2109 = vmatprep.mubr.msk.f32.mxu0 %vm79_vm0, %v1823_v22  ;;  %2190 = vmatprep.mubr.msk.f32.mxu1 %vm79_vm0, %v1821_v20 }
  0xcc   :  { %2110 = vmatmul.mubr.msk.f32.gmra.mrb[4].mxu0 %vm79_vm0, %v1824_v23  ;;  %2191 = vmatmul.mubr.msk.f32.gmra.mrb[2].mxu1 %vm79_vm0, %v1822_v21 }
  0xcd   :  { %2112 = vmatprep.mubr.msk.f32.mxu0 %vm79_vm0, %v1825_v24  ;;  %2193 = vmatprep.mubr.msk.f32.mxu1 %vm79_vm0, %v1823_v22 }
  0xd0   :  { %2113 = vmatmul.mubr.msk.f32.gmra.mrb[6].mxu0 %vm79_vm0, %v1826_v25  ;;  %2194 = vmatmul.mubr.msk.f32.gmra.mrb[4].mxu1 %vm79_vm0, %v1824_v23 }
  0xd1   :  { %2115 = vmatprep.mubr.msk.f32.mxu0 %vm79_vm0, %v1827_v26  ;;  %2196 = vmatprep.mubr.msk.f32.mxu1 %vm79_vm0, %v1825_v24 }
  0xd4   :  { %2116 = vmatmul.mubr.msk.f32.gmra.mrb[8].mxu0 %vm79_vm0, %v1828_v27  ;;  %2197 = vmatmul.mubr.msk.f32.gmra.mrb[6].mxu1 %vm79_vm0, %v1826_v25 }
  0xd5   :  { %2118 = vmatprep.mubr.msk.f32.mxu0 %vm79_vm0, %v1829_v28  ;;  %2199 = vmatprep.mubr.msk.f32.mxu1 %vm79_vm0, %v1827_v26 }
  0xd8   :  { %2119 = vmatmul.mubr.msk.f32.gmra.mrb[10].mxu0 %vm79_vm0, %v1830_v29  ;;  %2200 = vmatmul.mubr.msk.f32.gmra.mrb[8].mxu1 %vm79_vm0, %v1828_v27 }
  0xd9   :  { %2121 = vmatprep.mubr.msk.f32.mxu0 %vm79_vm0, %v1831_v30  ;;  %2202 = vmatprep.mubr.msk.f32.mxu1 %vm79_vm0, %v1829_v28 }
  0xdc   :  { %2122 = vmatmul.mubr.msk.f32.gmra.mrb[12].mxu0 %vm79_vm0, %v1832_v31  ;;  %2203 = vmatmul.mubr.msk.f32.gmra.mrb[10].mxu1 %vm79_vm0, %v1830_v29 }
  0xdd   :  { %2124 = vmatprep.mubr.msk.f32.mxu0 %vm79_vm0, %v1833_v32  ;;  %2205 = vmatprep.mubr.msk.f32.mxu1 %vm79_vm0, %v1831_v30 }
  0xe0   :  { %2125 = vmatmul.mubr.msk.f32.gmra.mrb[14].mxu0 %vm79_vm0, %v1834_v33  ;;  %2206 = vmatmul.mubr.msk.f32.gmra.mrb[12].mxu1 %vm79_vm0, %v1832_v31 }
  0xe1   :  { %2208 = vmatprep.mubr.msk.f32.mxu1 %vm79_vm0, %v1833_v32 }
  0xe4   :  { %2209 = vmatmul.mubr.msk.f32.gmra.mrb[14].mxu1 %vm79_vm0, %v1834_v33 }
 0x197   :  { %v2105_v35 = vpop.f32.mrb[0].mxu0 }
 0x198   :  { %vm706_vm3 = vcmp.gt.f32.partialorder %v2105_v35, 0.0  ;;  %v723_v36 = vmul.f32 %v2105_v35, %v2700_v34  ;;  %v610_v37 = vpop.f32.mrb[1].mxu0 }
 0x199   :  { %vm705_vm4 = vcmp.gt.f32.partialorder %v610_v37, 0.0  ;;  %v722_v38 = vmul.f32 %v2700_v34, %v610_v37 }
 0x19a   :  { %v2704_v39 = vsel %vm706_vm3, %v2105_v35, %v723_v36 }
 0x19b   :  { %v779_v40 = vmul.f32 %v2704_v39, %v2704_v39  ;;  %v2708_v41 = vsel %vm705_vm4, %v610_v37, %v722_v38  ;;  %v2108_v42 = vpop.f32.mrb[2].mxu0  ;;  %v2189_v43 = vpop.f32.mrb[0].mxu1 }
 0x19c   :  { %v778_v44 = vmul.f32 %v2708_v41, %v2708_v41  ;;  %vm708_vm5 = vcmp.gt.f32.partialorder %v2108_v42, 0.0  ;;  %v725_v45 = vmul.f32 %v2108_v42, %v2700_v34  ;;  %v620_v46 = vpop.f32.mrb[3].mxu0  ;;  %v1473_v47 = vpop.f32.mrb[1].mxu1  ;;  %vm1569_vm6 = vcmp.gt.f32.partialorder %v2189_v43, 0.0 }
 0x19d   :  { %v1585_v48 = vmul.f32 %v2189_v43, %v2700_v34  ;;  %vm707_vm7 = vcmp.gt.f32.partialorder %v620_v46, 0.0  ;;  %v724_v49 = vmul.f32 %v2700_v34, %v620_v46  ;;  %v754_v50 = vadd.f32 %v2704_v39, %v2708_v41 }
 0x19e   :  { %v2717_v51 = vsel %vm708_vm5, %v2108_v42, %v725_v45  ;;  %vm1568_vm8 = vcmp.gt.f32.partialorder %v1473_v47, 0.0  ;;  %v1584_v52 = vmul.f32 %v1473_v47, %v2700_v34  ;;  %v794_v53 = vadd.f32 %v779_v40, %v778_v44 }
 0x19f   :  { %v2720_v54 = vsel %vm1569_vm6, %v2189_v43, %v1585_v48  ;;  %v2722_v55 = vsel %vm707_vm7, %v620_v46, %v724_v49  ;;  %v2111_v56 = vpop.f32.mrb[4].mxu0  ;;  %v2192_v57 = vpop.f32.mrb[2].mxu1  ;;  %v781_v58 = vmul.f32 %v2717_v51, %v2717_v51 }
 0x1a0   :  { %v755_v59 = vadd.f32 %v754_v50, %v2722_v55  ;;  %v780_v60 = vmul.f32 %v2722_v55, %v2722_v55  ;;  %v2729_v61 = vsel %vm1568_vm8, %v1473_v47, %v1584_v52  ;;  %v630_v62 = vpop.f32.mrb[5].mxu0  ;;  %v1483_v63 = vpop.f32.mrb[3].mxu1  ;;  %v1641_v0 = vmul.f32 %v2720_v54, %v2720_v54 }
 0x1a1   :  { %v1640_v1 = vmul.f32 %v2729_v61, %v2729_v61  ;;  %vm710_vm9 = vcmp.gt.f32.partialorder %v2111_v56, 0.0  ;;  %v727_v2 = vmul.f32 %v2111_v56, %v2700_v34  ;;  %vm1571_vm10 = vcmp.gt.f32.partialorder %v2192_v57, 0.0 }
 0x1a2   :  { %v795_v3 = vadd.f32 %v794_v53, %v780_v60  ;;  %v1587_v4 = vmul.f32 %v2192_v57, %v2700_v34  ;;  %vm709_vm11 = vcmp.gt.f32.partialorder %v630_v62, 0.0  ;;  %v726_v5 = vmul.f32 %v2700_v34, %v630_v62 }
 0x1a3   :  { %v756_v6 = vadd.f32 %v755_v59, %v2717_v51  ;;  %v2114_v7 = vpop.f32.mrb[6].mxu0  ;;  %v2195_v8 = vpop.f32.mrb[4].mxu1  ;;  %v1616_v9 = vadd.f32 %v2720_v54, %v2729_v61  ;;  %v2741_v10 = vsel %vm710_vm9, %v2111_v56, %v727_v2  ;;  %vm1570_vm12 = vcmp.gt.f32.partialorder %v1483_v63, 0.0 }
 0x1a4   :  { %v796_v11 = vadd.f32 %v795_v3, %v781_v58  ;;  %v640_v12 = vpop.f32.mrb[7].mxu0  ;;  %v1493_v13 = vpop.f32.mrb[5].mxu1  ;;  %v1656_v14 = vadd.f32 %v1641_v0, %v1640_v1  ;;  %v2743_v15 = vsel %vm1571_vm10, %v2192_v57, %v1587_v4  ;;  %v2745_v16 = vsel %vm709_vm11, %v630_v62, %v726_v5 }
 0x1a5   :  { %v1586_v17 = vmul.f32 %v1483_v63, %v2700_v34  ;;  %v757_v18 = vadd.f32 %v756_v6, %v2745_v16  ;;  %v782_v19 = vmul.f32 %v2745_v16, %v2745_v16  ;;  %vm712_vm13 = vcmp.gt.f32.partialorder %v2114_v7, 0.0 }
 0x1a6   :  { %v729_v20 = vmul.f32 %v2114_v7, %v2700_v34  ;;  %v783_v21 = vmul.f32 %v2741_v10, %v2741_v10  ;;  %vm711_vm14 = vcmp.gt.f32.partialorder %v640_v12, 0.0  ;;  %v728_v23 = vmul.f32 %v2700_v34, %v640_v12 }
 0x1a7   :  { %v2754_v22 = vsel %vm1570_vm12, %v1483_v63, %v1586_v17  ;;  %v2117_v24 = vpop.f32.mrb[8].mxu0  ;;  %v2198_v25 = vpop.f32.mrb[6].mxu1  ;;  %v1643_v26 = vmul.f32 %v2743_v15, %v2743_v15  ;;  %v797_v27 = vadd.f32 %v796_v11, %v782_v19  ;;  %v1589_v33 = vmul.f32 %v2195_v8, %v2700_v34 }
 0x1a8   :  { %v1617_v28 = vadd.f32 %v1616_v9, %v2754_v22  ;;  %v1642_v29 = vmul.f32 %v2754_v22, %v2754_v22  ;;  %v650_v30 = vpop.f32.mrb[9].mxu0  ;;  %v1503_v31 = vpop.f32.mrb[7].mxu1  ;;  %v2762_v32 = vsel %vm712_vm13, %v2114_v7, %v729_v20  ;;  %v2765_v35 = vsel %vm711_vm14, %v640_v12, %v728_v23 }
 0x1a9   :  { %v758_v36 = vadd.f32 %v757_v18, %v2741_v10  ;;  %vm1573_vm15 = vcmp.gt.f32.partialorder %v2195_v8, 0.0  ;;  %v784_v38 = vmul.f32 %v2765_v35, %v2765_v35  ;;  %v798_v40 = vadd.f32 %v797_v27, %v783_v21 }
 0x1aa   :  { %v1657_v37 = vadd.f32 %v1656_v14, %v1642_v29  ;;  %vm1572_vm0 = vcmp.gt.f32.partialorder %v1493_v13, 0.0  ;;  %v1588_v43 = vmul.f32 %v1493_v13, %v2700_v34  ;;  %v1618_v44 = vadd.f32 %v1617_v28, %v2743_v15 }
 0x1ab   :  { %v759_v42 = vadd.f32 %v758_v36, %v2765_v35  ;;  %v2120_v45 = vpop.f32.mrb[10].mxu0  ;;  %v2201_v46 = vpop.f32.mrb[8].mxu1  ;;  %v785_v47 = vmul.f32 %v2762_v32, %v2762_v32  ;;  %v799_v48 = vadd.f32 %v798_v40, %v784_v38  ;;  %v2775_v53 = vsel %vm1573_vm15, %v2195_v8, %v1589_v33 }
 0x1ac   :  { %v1658_v49 = vadd.f32 %v1657_v37, %v1643_v26  ;;  %v660_v50 = vpop.f32.mrb[11].mxu0  ;;  %v1513_v52 = vpop.f32.mrb[9].mxu1  ;;  %v2777_v56 = vsel %vm1572_vm0, %v1493_v13, %v1588_v43  ;;  %v731_v57 = vmul.f32 %v2117_v24, %v2700_v34  ;;  %vm713_vm1 = vcmp.gt.f32.partialorder %v650_v30, 0.0 }
 0x1ad   :  { %v1619_v58 = vadd.f32 %v1618_v44, %v2777_v56  ;;  %v1644_v59 = vmul.f32 %v2777_v56, %v2777_v56  ;;  %v1591_v60 = vmul.f32 %v2198_v25, %v2700_v34  ;;  %v730_v62 = vmul.f32 %v2700_v34, %v650_v30 }
 0x1ae   :  { %vm714_vm2 = vcmp.gt.f32.partialorder %v2117_v24, 0.0  ;;  %vm1575_vm3 = vcmp.gt.f32.partialorder %v2198_v25, 0.0  ;;  %v760_v63 = vadd.f32 %v759_v42, %v2762_v32  ;;  %v800_v0 = vadd.f32 %v799_v48, %v785_v47 }
 0x1af   :  { %v2786_v1 = vpop.f32.mrb[12].mxu0  ;;  %v2204_v2 = vpop.f32.mrb[10].mxu1  ;;  %v1645_v3 = vmul.f32 %v2775_v53, %v2775_v53  ;;  %v1659_v4 = vadd.f32 %v1658_v49, %v1644_v59  ;;  %v2790_v5 = vsel %vm713_vm1, %v650_v30, %v730_v62  ;;  %vm1574_vm4 = vcmp.gt.f32.partialorder %v1503_v31, 0.0 }
 0x1b0   :  { %v670_v6 = vpop.f32.mrb[13].mxu0  ;;  %v1523_v7 = vpop.f32.mrb[11].mxu1  ;;  %v761_v8 = vadd.f32 %v760_v63, %v2790_v5  ;;  %v786_v9 = vmul.f32 %v2790_v5, %v2790_v5  ;;  %v1590_v11 = vmul.f32 %v1503_v31, %v2700_v34  ;;  %v1620_v12 = vadd.f32 %v1619_v58, %v2775_v53 }
 0x1b1   :  { %v2798_v13 = vsel %vm714_vm2, %v2117_v24, %v731_v57  ;;  %v2801_v14 = vsel %vm1575_vm3, %v2198_v25, %v1591_v60  ;;  %v1660_v17 = vadd.f32 %v1659_v4, %v1645_v3  ;;  %v733_v20 = vmul.f32 %v2120_v45, %v2700_v34 }
 0x1b2   :  { %v801_v18 = vadd.f32 %v800_v0, %v786_v9  ;;  %v2803_v19 = vsel %vm1574_vm4, %v1503_v31, %v1590_v11  ;;  %vm715_vm5 = vcmp.gt.f32.partialorder %v660_v50, 0.0  ;;  %v1593_v27 = vmul.f32 %v2201_v46, %v2700_v34 }
 0x1b3   :  { %v2806_v21 = vpop.f32.mrb[14].mxu0  ;;  %v2808_v23 = vpop.f32.mrb[12].mxu1  ;;  %v1621_v26 = vadd.f32 %v1620_v12, %v2803_v19  ;;  %v1646_v24 = vmul.f32 %v2803_v19, %v2803_v19  ;;  %v732_v25 = vmul.f32 %v2700_v34, %v660_v50  ;;  %v787_v30 = vmul.f32 %v2798_v13, %v2798_v13 }
 0x1b4   :  { %v680_v28 = vpop.f32.mrb[15].mxu0  ;;  %v1533_v29 = vpop.f32.mrb[13].mxu1  ;;  %vm716_vm6 = vcmp.gt.f32.partialorder %v2120_v45, 0.0  ;;  %vm1577_vm7 = vcmp.gt.f32.partialorder %v2201_v46, 0.0  ;;  %v762_v31 = vadd.f32 %v761_v8, %v2798_v13  ;;  %v1647_v33 = vmul.f32 %v2801_v14, %v2801_v14 }
 0x1b5   :  { %v1661_v36 = vadd.f32 %v1660_v17, %v1646_v24  ;;  %v2820_v37 = vsel %vm715_vm5, %v660_v50, %v732_v25  ;;  %vm1576_vm8 = vcmp.gt.f32.partialorder %v1513_v52, 0.0  ;;  %v1592_v40 = vmul.f32 %v1513_v52, %v2700_v34 }
 0x1b6   :  { %v763_v38 = vadd.f32 %v762_v31, %v2820_v37  ;;  %v1622_v42 = vadd.f32 %v1621_v26, %v2801_v14  ;;  %v2827_v44 = vsel %vm716_vm6, %v2120_v45, %v733_v20  ;;  %v2829_v47 = vsel %vm1577_vm7, %v2201_v46, %v1593_v27 }
 0x1b7   :  { %v2825_v43 = vpop.f32.mrb[14].mxu1  ;;  %v802_v48 = vadd.f32 %v801_v18, %v787_v30  ;;  %v1662_v49 = vadd.f32 %v1661_v36, %v1647_v33  ;;  %v788_v50 = vmul.f32 %v2820_v37, %v2820_v37  ;;  %v2833_v58 = vsel %vm1576_vm8, %v1513_v52, %v1592_v40 }
 0x1b8   :  { %v1543_v57 = vpop.f32.mrb[15].mxu1  ;;  %v1595_v59 = vmul.f32 %v2204_v2, %v2700_v34  ;;  %vm717_vm9 = vcmp.gt.f32.partialorder %v670_v6, 0.0  ;;  %v1623_v60 = vadd.f32 %v1622_v42, %v2833_v58  ;;  %v1648_v62 = vmul.f32 %v2833_v58, %v2833_v58 }
 0x1b9   :  { %vm1579_vm10 = vcmp.gt.f32.partialorder %v2204_v2, 0.0  ;;  %v734_v45 = vmul.f32 %v2700_v34, %v670_v6  ;;  %v789_v46 = vmul.f32 %v2827_v44, %v2827_v44  ;;  %v1649_v63 = vmul.f32 %v2829_v47, %v2829_v47 }
 0x1ba   :  { %v764_v52 = vadd.f32 %v763_v38, %v2827_v44  ;;  %vm1578_vm11 = vcmp.gt.f32.partialorder %v1523_v7, 0.0  ;;  %v1663_v0 = vadd.f32 %v1662_v49, %v1648_v62  ;;  %vm718_vm12 = vcmp.gt.f32.partialorder %v2786_v1, 0.0 }
 0x1bb   :  { %v2846_v3 = vsel %vm717_vm9, %v670_v6, %v734_v45  ;;  %v1594_v4 = vmul.f32 %v1523_v7, %v2700_v34  ;;  %v803_v8 = vadd.f32 %v802_v48, %v788_v50  ;;  %v735_v9 = vmul.f32 %v2786_v1, %v2700_v34 }
 0x1bc   :  { %v2851_v11 = vsel %vm1579_vm10, %v2204_v2, %v1595_v59  ;;  %v1624_v12 = vadd.f32 %v1623_v60, %v2829_v47  ;;  %v765_v17 = vadd.f32 %v764_v52, %v2846_v3  ;;  %v1664_v20 = vadd.f32 %v1663_v0, %v1649_v63 }
 0x1bd   :  { %v2855_v18 = vsel %vm1578_vm11, %v1523_v7, %v1594_v4  ;;  %v737_v26 = vmul.f32 %v2806_v21, %v2700_v34  ;;  %vm1581_vm13 = vcmp.gt.f32.partialorder %v2808_v23, 0.0  ;;  %v1597_v2 = vmul.f32 %v2808_v23, %v2700_v34 }
 0x1be   :  { %v1625_v6 = vadd.f32 %v1624_v12, %v2855_v18  ;;  %v1650_v24 = vmul.f32 %v2855_v18, %v2855_v18  ;;  %vm719_vm14 = vcmp.gt.f32.partialorder %v680_v28, 0.0  ;;  %v736_v27 = vmul.f32 %v2700_v34, %v680_v28 }
 0x1bf   :  { %vm1580_vm15 = vcmp.gt.f32.partialorder %v1533_v29, 0.0  ;;  %v1596_v7 = vmul.f32 %v1533_v29, %v2700_v34  ;;  %v2870_v25 = vsel %vm718_vm12, %v2786_v1, %v735_v9  ;;  %vm720_vm0 = vcmp.gt.f32.partialorder %v2806_v21, 0.0 }
 0x1c0   :  { %v1665_v30 = vadd.f32 %v1664_v20, %v1650_v24  ;;  %v1626_v31 = vadd.f32 %v1625_v6, %v2851_v11  ;;  %v1651_v33 = vmul.f32 %v2851_v11, %v2851_v11  ;;  %v790_v36 = vmul.f32 %v2846_v3, %v2846_v3 }
 0x1c1   :  { %v2879_v38 = vsel %vm1581_vm13, %v2808_v23, %v1597_v2  ;;  %v2881_v40 = vsel %vm1580_vm15, %v1533_v29, %v1596_v7  ;;  %v2883_v42 = vsel %vm719_vm14, %v680_v28, %v736_v27  ;;  %vm1582_vm1 = vcmp.gt.f32.partialorder %v1543_v57, 0.0 }
 0x1c2   :  { %v1627_v1 = vadd.f32 %v1626_v31, %v2881_v40  ;;  %v1652_v48 = vmul.f32 %v2881_v40, %v2881_v40  ;;  %v791_v49 = vmul.f32 %v2870_v25, %v2870_v25  ;;  %v2891_v50 = vsel %vm720_vm0, %v2806_v21, %v737_v26 }
 0x1c3   :  { %v1598_v59 = vmul.f32 %v1543_v57, %v2700_v34  ;;  %v766_v23 = vadd.f32 %v765_v17, %v2870_v25  ;;  %v1599_v28 = vmul.f32 %v2825_v43, %v2700_v34  ;;  %v804_v29 = vadd.f32 %v803_v8, %v789_v46 }
 0x1c4   :  { %v1628_v60 = vadd.f32 %v1627_v1, %v2879_v38  ;;  %v1666_v62 = vadd.f32 %v1665_v30, %v1651_v33  ;;  %v1653_v45 = vmul.f32 %v2879_v38, %v2879_v38  ;;  %vm1583_vm2 = vcmp.gt.f32.partialorder %v2825_v43, 0.0 }
 0x1c5   :  { %v2901_v63 = vsel %vm1582_vm1, %v1543_v57, %v1598_v59  ;;  %v767_v21 = vadd.f32 %v766_v23, %v2883_v42  ;;  %v792_v52 = vmul.f32 %v2883_v42, %v2883_v42  ;;  %v805_v0 = vadd.f32 %v804_v29, %v790_v36 }
 0x1c6   :  { %v1629_v4 = vadd.f32 %v1628_v60, %v2901_v63  ;;  %v1667_v34 = vadd.f32 %v1666_v62, %v1652_v48  ;;  %v1654_v46 = vmul.f32 %v2901_v63, %v2901_v63  ;;  %v2911_v9 = vsel %vm1583_vm2, %v2825_v43, %v1599_v28 }
 0x1c7   :  { %v768_v8 = vadd.f32 %v767_v21, %v2891_v50  ;;  %v806_v12 = vadd.f32 %v805_v0, %v791_v49  ;;  %v793_v20 = vmul.f32 %v2891_v50, %v2891_v50  ;;  %v1655_v2 = vmul.f32 %v2911_v9, %v2911_v9 }
 0x1c8   :  { %v1668_v57 = vadd.f32 %v1667_v34, %v1653_v45  ;;  %v1630_v17 = vadd.f32 %v1629_v4, %v2911_v9 }
 0x1c9   :  { %769 = vadd.xlane.f32.xlu0 %v768_v8  ;;  %v807_v26 = vadd.f32 %v806_v12, %v792_v52 }
 0x1ca   :  { %v1669_v6 = vadd.f32 %v1668_v57, %v1654_v46 }
 0x1cb   :  { %v808_v24 = vadd.f32 %v807_v26, %v793_v20 }
 0x1cc   :  { %v1670_v27 = vadd.f32 %v1669_v6, %v1655_v2  ;;  %v833_v2 = vlaneseq }
 0x1cd   :  { %1631 = vadd.xlane.f32.xlu0 %v1630_v17  ;;  %809 = vadd.xlane.f32.xlu1 %v808_v24 }
 0x1d1   :  { %1671 = vadd.xlane.f32.xlu0 %v1670_v27  ;;  %v834_v27 = vshrl.u32 %v833_v2, 7 }
 0x256   :  { %v770_v43 = vpop.xlane.xlu0 %769 }
 0x257   :  { %v771_v7 = vrot.slane %v770_v43, 4 }
 0x259   :  { %v772_v30 = vadd.f32 %v771_v7, %v770_v43  ;;  %v2926_v43 = vld [vmem:[%s3004_s3] sm:$0x1]  ;;  %v2928_v7 = vsub.s32 0, %v834_v27 }
 0x25a   :  { %v810_v33 = vpop.xlane.xlu1 %809  ;;  %v1632_v62 = vpop.xlane.xlu0 %1631 }
 0x25b   :  { %v773_v31 = vrot.slane %v772_v30, 2  ;;  %v811_v36 = vrot.slane %v810_v33, 4  ;;  %v1633_v21 = vrot.slane %v1632_v62, 4 }
 0x25d   :  { %v774_v1 = vadd.f32 %v773_v31, %v772_v30  ;;  %v812_v48 = vadd.f32 %v811_v36, %v810_v33  ;;  %v1634_v0 = vadd.f32 %v1633_v21, %v1632_v62  ;;  %v2937_v36 = vld [vmem:[%s3005_s4] sm:$0x1] }
 0x25e   :  { %v1672_v45 = vpop.xlane.xlu0 %1671 }
 0x25f   :  { %v775_v49 = vrot.slane %v774_v1, 1  ;;  %v813_v59 = vrot.slane %v812_v48, 2  ;;  %v1673_v52 = vrot.slane %v1672_v45, 4  ;;  %v1635_v34 = vrot.slane %v1634_v0, 2 }
 0x261   :  { %v776_v23 = vadd.f32 %v775_v49, %v774_v1  ;;  %v814_v28 = vadd.f32 %v813_v59, %v812_v48  ;;  %v1674_v4 = vadd.f32 %v1673_v52, %v1672_v45  ;;  %v1636_v12 = vadd.f32 %v1635_v34, %v1634_v0 }
 0x263   :  { %2299 = vpush %v776_v23  ;;  %v815_v29 = vrot.slane %v814_v28, 1  ;;  %v1675_v46 = vrot.slane %v1674_v4, 2  ;;  %v1637_v17 = vrot.slane %v1636_v12, 1 }
 0x265   :  { %v816_v60 = vadd.f32 %v815_v29, %v814_v28  ;;  %v1676_v57 = vadd.f32 %v1675_v46, %v1674_v4  ;;  %v1638_v6 = vadd.f32 %v1637_v17, %v1636_v12 }
 0x267   :  { %2301 = vpush %v816_v60  ;;  %v1677_v20 = vrot.slane %v1676_v57, 1 }
 0x269   :  { %v1678_v24 = vadd.f32 %v1677_v20, %v1676_v57 }
 0x294   :  { %s2300_s1 = spop %2299 }
 0x295   :  { %s2918_s2 = smul.f32 6.1035156e-05, %s2300_s1 }
 0x297   :  { %s820_s30 = smul.f32 %s2918_s2, %s2918_s2  ;;  %v829_v33 = vstv %s2918_s2 }
 0x298   :  { %s2302_s6 = spop %2301 }
 0x299   :  { %s819_s7 = smul.f32 6.1035156e-05, %s2302_s6 }
 0x29b   :  { %s821_s8 = ssub.f32 %s819_s7, %s820_s30 }
 0x29d   :  { %s822_s10 = smax.f32 %s2387_s9, %s821_s8 }
 0x29e   :  { %s823_s11 = sadd.f32 1e-08, %s822_s10 }
 0x2a0   :  { %v824_v8 = vstv %s823_s11 }
 0x2a1   :  { %2357 = vrsqrt.f32 %v824_v8 }
 0x2ab   :  { %v2358_v26 = vpop.eup %2357 }
 0x2ac   :  { %2303 = vpush %v2358_v26 }
 0x2ad   :  { %2305 = vpush %v1638_v6 }
 0x2ae   :  { %2307 = vpush %v1678_v24 }
 0x2dd   :  { %s2304_s13 = spop %2303 }
 0x2de   :  { %v827_v30 = vstv %s2304_s13  ;;  %s2306_s14 = spop %2305 }
 0x2df   :  { %v828_v31 = vmul.f32 %v827_v30, %v2926_v43  ;;  %s2931_s15 = smul.f32 6.1035156e-05, %s2306_s14  ;;  %s2308_s16 = spop %2307 }
 0x2e0   :  { %s1681_s19 = smul.f32 6.1035156e-05, %s2308_s16 }
 0x2e1   :  { %v830_v1 = vmul.f32 %v829_v33, %v828_v31  ;;  %v836_v48 = vrot.slane %v828_v31, %v2928_v7  ;;  %s1682_s3 = smul.f32 %s2931_s15, %s2931_s15  ;;  %v1691_v2 = vstv %s2931_s15 }
 0x2e3   :  { %v831_v49 = vsub.f32 %v2937_v36, %v830_v1  ;;  %s1683_s20 = ssub.f32 %s1681_s19, %s1682_s3  ;;  %v838_v59 = vmul.f32 %v836_v48, %v2708_v41  ;;  %v839_v23 = vmul.f32 %v836_v48, %v2704_v39  ;;  %v840_v28 = vmul.f32 %v836_v48, %v2722_v55 }
 0x2e4   :  { %v841_v29 = vmul.f32 %v836_v48, %v2717_v51  ;;  %v842_v60 = vmul.f32 %v836_v48, %v2745_v16  ;;  %v843_v62 = vmul.f32 %v836_v48, %v2741_v10  ;;  %v844_v45 = vmul.f32 %v836_v48, %v2765_v35 }
 0x2e5   :  { %s1684_s4 = smax.f32 %s2387_s9, %s1683_s20  ;;  %v845_v21 = vmul.f32 %v836_v48, %v2762_v32  ;;  %v846_v52 = vmul.f32 %v836_v48, %v2790_v5  ;;  %v847_v41 = vmul.f32 %v836_v48, %v2798_v13  ;;  %v848_v39 = vmul.f32 %v836_v48, %v2820_v37 }
 0x2e6   :  { %s1685_s21 = sadd.f32 1e-08, %s1684_s4  ;;  %v849_v55 = vmul.f32 %v836_v48, %v2827_v44  ;;  %v850_v51 = vmul.f32 %v836_v48, %v2846_v3  ;;  %v858_v16 = vrot.slane %v831_v49, %v2928_v7  ;;  %v851_v10 = vmul.f32 %v836_v48, %v2870_v25 }
 0x2e7   :  { %v852_v0 = vmul.f32 %v836_v48, %v2883_v42  ;;  %v853_v35 = vmul.f32 %v836_v48, %v2891_v50 }
 0x2e8   :  { %v1686_v32 = vstv %s1685_s21  ;;  %v860_v4 = vadd.f32 %v858_v16, %v838_v59  ;;  %v861_v5 = vadd.f32 %v858_v16, %v839_v23  ;;  %v862_v34 = vadd.f32 %v858_v16, %v840_v28 }
 0x2e9   :  { %v863_v13 = vadd.f32 %v858_v16, %v841_v29  ;;  %v864_v46 = vadd.f32 %v858_v16, %v842_v60  ;;  %v865_v8 = vadd.f32 %v858_v16, %v843_v62  ;;  %v866_v37 = vadd.f32 %v858_v16, %v844_v45 }
 0x2ea   :  { %v867_v12 = vadd.f32 %v858_v16, %v845_v21  ;;  %v868_v44 = vadd.f32 %v858_v16, %v846_v52  ;;  %v869_v57 = vadd.f32 %v858_v16, %v847_v41  ;;  %v870_v3 = vadd.f32 %v858_v16, %v848_v39  ;;  %876 = vst [vmem:[#allocation3] sm:$0xff] %v860_v4 }
 0x2eb   :  { %v871_v17 = vadd.f32 %v858_v16, %v849_v55  ;;  %877 = vst [vmem:[#allocation3 + $0x8] sm:$0xff] %v861_v5  ;;  %878 = vst [vmem:[#allocation3 + $0x10] sm:$0xff] %v862_v34  ;;  %v872_v25 = vadd.f32 %v858_v16, %v850_v51  ;;  %v873_v42 = vadd.f32 %v858_v16, %v851_v10  ;;  %2359 = vrsqrt.f32 %v1686_v32 }
 0x2ec   :  { %879 = vst [vmem:[#allocation3 + $0x18] sm:$0xff] %v863_v13  ;;  %v874_v50 = vadd.f32 %v858_v16, %v852_v0  ;;  %v875_v20 = vadd.f32 %v858_v16, %v853_v35  ;;  %880 = vst [vmem:[#allocation3 + $0x20] sm:$0xff] %v864_v46 }
 0x2ed   :  { %881 = vst [vmem:[#allocation3 + $0x28] sm:$0xff] %v865_v8  ;;  %882 = vst [vmem:[#allocation3 + $0x30] sm:$0xff] %v866_v37 }
 0x2ee   :  { %883 = vst [vmem:[#allocation3 + $0x38] sm:$0xff] %v867_v12  ;;  %884 = vst [vmem:[#allocation3 + $0x40] sm:$0xff] %v868_v44 }
 0x2ef   :  { %885 = vst [vmem:[#allocation3 + $0x48] sm:$0xff] %v869_v57  ;;  %886 = vst [vmem:[#allocation3 + $0x50] sm:$0xff] %v870_v3 }
 0x2f0   :  { %887 = vst [vmem:[#allocation3 + $0x58] sm:$0xff] %v871_v17  ;;  %888 = vst [vmem:[#allocation3 + $0x60] sm:$0xff] %v872_v25 }
 0x2f1   :  { %889 = vst [vmem:[#allocation3 + $0x68] sm:$0xff] %v873_v42  ;;  %890 = vst [vmem:[#allocation3 + $0x70] sm:$0xff] %v874_v50 }
 0x2f2   :  { %891 = vst [vmem:[#allocation3 + $0x78] sm:$0xff] %v875_v20 }
 0x2f5   :  { %v2360_v26 = vpop.eup %2359 }
 0x2f6   :  { %2309 = vpush %v2360_v26 }
 0x327   :  { %s2310_s22 = spop %2309 }
 0x328   :  { %v1689_v6 = vstv %s2310_s22 }
 0x329   :  { %v1690_v24 = vmul.f32 %v1689_v6, %v2926_v43 }
 0x32b   :  { %v1692_v27 = vmul.f32 %v1691_v2, %v1690_v24  ;;  %v1698_v30 = vrot.slane %v1690_v24, %v2928_v7 }
 0x32d   :  { %v1693_v31 = vsub.f32 %v2937_v36, %v1692_v27  ;;  %v1700_v33 = vmul.f32 %v1698_v30, %v2729_v61  ;;  %v1701_v1 = vmul.f32 %v1698_v30, %v2720_v54  ;;  %v1702_v48 = vmul.f32 %v1698_v30, %v2754_v22 }
 0x32e   :  { %v1703_v49 = vmul.f32 %v1698_v30, %v2743_v15  ;;  %v1704_v59 = vmul.f32 %v1698_v30, %v2777_v56  ;;  %v1705_v23 = vmul.f32 %v1698_v30, %v2775_v53  ;;  %v1706_v43 = vmul.f32 %v1698_v30, %v2803_v19 }
 0x32f   :  { %v1707_v28 = vmul.f32 %v1698_v30, %v2801_v14  ;;  %v1708_v29 = vmul.f32 %v1698_v30, %v2833_v58  ;;  %v1709_v36 = vmul.f32 %v1698_v30, %v2829_v47  ;;  %v1710_v61 = vmul.f32 %v1698_v30, %v2855_v18 }
 0x330   :  { %v1711_v54 = vmul.f32 %v1698_v30, %v2851_v11  ;;  %v1720_v22 = vrot.slane %v1693_v31, %v2928_v7  ;;  %v1712_v15 = vmul.f32 %v1698_v30, %v2881_v40  ;;  %v1713_v56 = vmul.f32 %v1698_v30, %v2879_v38 }
 0x331   :  { %v1714_v53 = vmul.f32 %v1698_v30, %v2901_v63  ;;  %v1715_v19 = vmul.f32 %v1698_v30, %v2911_v9 }
 0x332   :  { %v1722_v14 = vadd.f32 %v1720_v22, %v1700_v33  ;;  %v1723_v58 = vadd.f32 %v1720_v22, %v1701_v1  ;;  %v1724_v60 = vadd.f32 %v1720_v22, %v1702_v48  ;;  %v1725_v47 = vadd.f32 %v1720_v22, %v1703_v49 }
 0x333   :  { %v1726_v62 = vadd.f32 %v1720_v22, %v1704_v59  ;;  %v1727_v18 = vadd.f32 %v1720_v22, %v1705_v23  ;;  %v1728_v45 = vadd.f32 %v1720_v22, %v1706_v43  ;;  %v1729_v11 = vadd.f32 %v1720_v22, %v1707_v28 }
 0x334   :  { %v1730_v21 = vadd.f32 %v1720_v22, %v1708_v29  ;;  %v1731_v7 = vadd.f32 %v1720_v22, %v1709_v36  ;;  %v1732_v52 = vadd.f32 %v1720_v22, %v1710_v61  ;;  %v1733_v40 = vadd.f32 %v1720_v22, %v1711_v54  ;;  %1739 = vst [vmem:[#allocation3 + $0x80] sm:$0xff] %v1722_v14 }
 0x335   :  { %1740 = vst [vmem:[#allocation3 + $0x88] sm:$0xff] %v1723_v58  ;;  %1741 = vst [vmem:[#allocation3 + $0x90] sm:$0xff] %v1724_v60  ;;  %v1734_v38 = vadd.f32 %v1720_v22, %v1712_v15  ;;  %v1735_v63 = vadd.f32 %v1720_v22, %v1713_v56  ;;  %v1736_v9 = vadd.f32 %v1720_v22, %v1714_v53 }
 0x336   :  { %1742 = vst [vmem:[#allocation3 + $0x98] sm:$0xff] %v1725_v47  ;;  %v1737_v41 = vadd.f32 %v1720_v22, %v1715_v19  ;;  %1743 = vst [vmem:[#allocation3 + $0xa0] sm:$0xff] %v1726_v62 }
 0x337   :  { %1744 = vst [vmem:[#allocation3 + $0xa8] sm:$0xff] %v1727_v18  ;;  %1745 = vst [vmem:[#allocation3 + $0xb0] sm:$0xff] %v1728_v45 }
 0x338   :  { %1746 = vst [vmem:[#allocation3 + $0xb8] sm:$0xff] %v1729_v11  ;;  %1747 = vst [vmem:[#allocation3 + $0xc0] sm:$0xff] %v1730_v21 }
 0x339   :  { %1748 = vst [vmem:[#allocation3 + $0xc8] sm:$0xff] %v1731_v7  ;;  %1749 = vst [vmem:[#allocation3 + $0xd0] sm:$0xff] %v1732_v52 }
 0x33a   :  { %1750 = vst [vmem:[#allocation3 + $0xd8] sm:$0xff] %v1733_v40  ;;  %1751 = vst [vmem:[#allocation3 + $0xe0] sm:$0xff] %v1734_v38 }
 0x33b   :  { %1752 = vst [vmem:[#allocation3 + $0xe8] sm:$0xff] %v1735_v63  ;;  %1753 = vst [vmem:[#allocation3 + $0xf0] sm:$0xff] %v1736_v9 }
 0x33c   :  { %1754 = vst [vmem:[#allocation3 + $0xf8] sm:$0xff] %v1737_v41 }
 0x33d   :  { %2372 = shalt.err (!%p2369_p4)
}
 0x33e   :  { %s2373_s28 = scalar_lea.hbm %s3006_s5, 4096 }
 0x33f   :  { %p2374_p5 = scmp.ne.s32.totalorder %s3006_s5, %s2373_s28  ;;  %p2377_p6 = scmp.lt.u32.totalorder %s2373_s28, %s3006_s5 }
 0x341   :  { %p2379_p7 = pnand %p2377_p6, %p2374_p5 }
 0x343   :  { %2382 = shalt.err (!%p2379_p7)
}
 0x344   :  { %s2389_s6 = smov 128   ;;  %s2390_s7 = smov 8  }
 0x345   :  { %1766 = dma.vmem_to_hbm [thread:$0]  %s2982_s24, 4096, %s3006_s5, [#allocation4], %s2389_s6, %s2389_s6, %s2390_s7  }
 0x346   :  { %2383 = dma.done.wait [#allocation4], 4096  }
 0x347   :  { %2384 = vsyncadd [#allocation4], 4294963200 }
 0x348   :  { %1770 = vsyncpa [#allocation4], 1 }

</bundles_post_ra>
